<compile_context>
chip_gen: v7x
topology: tpu7x:2x2x1
jax: 0.10.0
libtpu: 0.0.40
codegen_flags: <defaults>
</compile_context>

<pallas_src>
import math

import jax
import jax.numpy as jnp
from jax.experimental import pallas as pl
from jax.experimental.pallas import tpu as pltpu

XDIM = 71        # tabular feature dimension (fixed by the module)
ZDIM = 8         # latent dimension (zdim)

# padded sizes
X_PAD = 128      # 71  -> 128 ; lanes 120:128 of the input slab carry eps
EPS_LANE = 120
H1, H2, H3 = 120, 200, 120
H1P, H2P, H3P = 128, 256, 128
P_LANES = 256    # every packed parameter block is 256 lanes wide
OUT_LANES = 128  # packed output slab: [0:71] xhat, [96:128] z|logqz|mu|std
LAT0 = OUT_LANES - 4 * ZDIM          # = 96

# row offsets of each (row-padded) weight block inside the packed buffer.
# All offsets are multiples of 16 so bf16 (16,128) tiles are never straddled.
_R_EW0 = 0                      # (71, 120)  in (128, 256)
_R_EW1 = _R_EW0 + 128           # (120, 200) in (128, 256)
_R_EW2 = _R_EW1 + 128           # (200, 120) in (256, 256)
_R_EW3 = _R_EW2 + 256           # (120, 16)  in (128, 256)   fused mu|sigma head
_R_DW0 = _R_EW3 + 128           # (8, 120)   in (16, 256)
_R_DW1 = _R_DW0 + 16            # (120, 200) in (128, 256)
_R_DW2 = _R_DW1 + 128           # (200, 120) in (256, 256)
_R_DW3 = _R_DW2 + 256           # (120, 71)  in (128, 256)
_R_BIAS = _R_DW3 + 128          # 8 biases, one per 16-row block
P_ROWS = _R_BIAS + 8 * 16       # = 1296 rows total (multiple of 16)

_HALF_LOG_2PI = 0.5 * math.log(2.0 * math.pi)
TILE_B_MAX = 1024               # max batch-tile rows per grid step
MIN_SPLIT = 256                 # force >=2 grid steps once b8 >= 2*MIN_SPLIT (v7x)


def _vae_kernel(x_ref, p_ref, out_ref):
    f32 = jnp.float32
    bf16 = jnp.bfloat16

    x = x_ref[...]                              # (TB, 128) f32
    eps = x[:, EPS_LANE:EPS_LANE + ZDIM]        # reparam noise, kept in f32

    def mm(a, row, rows, n):
        # bf16 MXU matmul with f32 accumulation; weights are already bf16.
        return jnp.dot(a.astype(bf16), p_ref[row:row + rows, 0:n],
                       preferred_element_type=f32)

    def bias(i, n):
        r = _R_BIAS + 16 * i
        return p_ref[r:r + 1, 0:n]              # (1, n) bf16, upcasts on add

    relu = lambda t: jnp.maximum(t, 0.0)

    # ---- Encoder: 71->120->200->120->(mu|sigma), lane-padded / unmasked ----
    h = relu(mm(x, _R_EW0, X_PAD, H1P) + bias(0, H1P))
    h = relu(mm(h, _R_EW1, H1P, H2P) + bias(1, H2P))
    h = relu(mm(h, _R_EW2, H2P, H3P) + bias(2, H3P))
    head = mm(h, _R_EW3, H3P, 128) + bias(3, 128)       # lanes 0:16 real

    mu = head[:, 0:ZDIM]
    sigma = head[:, ZDIM:2 * ZDIM]

    # ---- Reparameterization + Normal(mu, std).log_prob(z) (f32) ----
    std = jnp.exp(sigma)
    z = mu + std * eps
    logqz = -sigma - _HALF_LOG_2PI - 0.5 * (eps * eps)  # exact given z = mu+std*eps

    # ---- Decoder: zdim->120->200->120->71 + Sigmoid ----
    d = relu(mm(z, _R_DW0, ZDIM, H1P) + bias(4, H1P))
    d = relu(mm(d, _R_DW1, H1P, H2P) + bias(5, H2P))
    d = relu(mm(d, _R_DW2, H2P, H3P) + bias(6, H3P))
    xhat = jax.nn.sigmoid(mm(d, _R_DW3, H3P, 128) + bias(7, 128))

    # ---- Packed 128-lane output slab: one full store + one 32-lane store ----
    # lanes 71:96 contain junk (sigmoid(0)); the wrapper slices them away.
    out_ref[...] = xhat
    out_ref[:, LAT0:] = jnp.concatenate([z, logqz, mu, std], axis=-1)


# -------------------------- parameter handling --------------------------

def _init_linear(key, fan_in, fan_out):
    """PyTorch nn.Linear default init; weight already stored as (in, out)."""
    kw, kb = jax.random.split(key)
    bound = 1.0 / math.sqrt(fan_in)
    w = jax.random.uniform(kw, (fan_in, fan_out), jnp.float32, -bound, bound)
    b = jax.random.uniform(kb, (fan_out,), jnp.float32, -bound, bound)
    return w, b


def init_vae_params(key, zdim=ZDIM):
    keys = jax.random.split(key, 8)
    ew0, eb0 = _init_linear(keys[0], XDIM, H1)
    ew1, eb1 = _init_linear(keys[1], H1, H2)
    ew2, eb2 = _init_linear(keys[2], H2, H3)
    ew3, eb3 = _init_linear(keys[3], H3, 2 * zdim)      # fused mu|sigma head
    dw0, db0 = _init_linear(keys[4], zdim, H1)
    dw1, db1 = _init_linear(keys[5], H1, H2)
    dw2, db2 = _init_linear(keys[6], H2, H3)
    dw3, db3 = _init_linear(keys[7], H3, XDIM)
    return (ew0, eb0, ew1, eb1, ew2, eb2, ew3, eb3,
            dw0, db0, dw1, db1, dw2, db2, dw3, db3)


def pack_vae_params(params):
    """Pack all weights/biases into one zero-padded (1296, 256) bf16 buffer."""
    (ew0, eb0, ew1, eb1, ew2, eb2, ew3, eb3,
     dw0, db0, dw1, db1, dw2, db2, dw3, db3) = params

    def wblk(w, rows):
        blk = jnp.zeros((rows, P_LANES), jnp.float32)
        return blk.at[:w.shape[0], :w.shape[1]].set(w)

    def bblk(b):
        blk = jnp.zeros((16, P_LANES), jnp.float32)
        return blk.at[0, :b.shape[-1]].set(b.reshape(-1))

    packed = jnp.concatenate(
        [wblk(ew0, 128), wblk(ew1, 128), wblk(ew2, 256), wblk(ew3, 128),
         wblk(dw0, 16), wblk(dw1, 128), wblk(dw2, 256), wblk(dw3, 128),
         bblk(eb0), bblk(eb1), bblk(eb2), bblk(eb3),
         bblk(db0), bblk(db1), bblk(db2), bblk(db3)],
        axis=0).astype(jnp.bfloat16)
    assert packed.shape == (P_ROWS, P_LANES)
    return packed


# ------------------------------ forward ------------------------------

def _round_up(a, m):
    return ((a + m - 1) // m) * m


@jax.jit
def vae_forward(x, eps, packed_params):
    """Returns (xhat, z, logqz, mu, std)."""
    x = x.reshape(-1, XDIM)                     # mirrors x.view(-1, 71)
    b = x.shape[0]
    b8 = _round_up(b, 8)

    # Adaptive batch tiling: minimize padding waste, and keep >=2 grid steps
    # once the batch is big enough so both v7x TensorCores get work.
    n_steps = max(1, -(-b8 // TILE_B_MAX))
    if b8 >= 2 * MIN_SPLIT:
        n_steps = max(n_steps, 2)
    tile_b = _round_up(-(-b8 // n_steps), 8)
    b_pad = tile_b * n_steps

    # Single padded input slab: x in lanes 0:71, eps in lanes 120:128.
    xin = (jnp.zeros((b_pad, X_PAD), jnp.float32)
           .at[:b, :XDIM].set(x)
           .at[:b, EPS_LANE:EPS_LANE + ZDIM].set(eps))

    flops = 2 * b_pad * (XDIM * H1 + H1 * H2 + H2 * H3 + H3 * 2 * ZDIM +
                         ZDIM * H1 + H1 * H2 + H2 * H3 + H3 * XDIM)
    cost = pl.CostEstimate(
        flops=flops,
        transcendentals=b_pad * (ZDIM + XDIM),
        bytes_accessed=(b_pad * X_PAD * 4 + b_pad * OUT_LANES * 4 +
                        P_ROWS * P_LANES * 2))

    out = pl.pallas_call(
        _vae_kernel,
        out_shape=jax.ShapeDtypeStruct((b_pad, OUT_LANES), jnp.float32),
        grid=(n_steps,),
        in_specs=[
            pl.BlockSpec((tile_b, X_PAD), lambda i: (i, 0)),
            pl.BlockSpec((P_ROWS, P_LANES), lambda i: (0, 0)),  # VMEM-resident
        ],
        out_specs=pl.BlockSpec((tile_b, OUT_LANES), lambda i: (i, 0)),
        compiler_params=pltpu.CompilerParams(
            dimension_semantics=("parallel",),
            # worst-case footprint ~8 MiB at TILE_B_MAX; explicit limit keeps
            # v5e (16 MiB scoped default) comfortable and is a no-op elsewhere
            vmem_limit_bytes=32 * 1024 * 1024),
        cost_estimate=cost,
    )(xin, packed_params)

    xhat = out[:b, 0:XDIM]
    z = out[:b, LAT0 + 0 * ZDIM:LAT0 + 1 * ZDIM]
    logqz = out[:b, LAT0 + 1 * ZDIM:LAT0 + 2 * ZDIM]
    mu = out[:b, LAT0 + 2 * ZDIM:LAT0 + 3 * ZDIM]
    std = out[:b, LAT0 + 3 * ZDIM:LAT0 + 4 * ZDIM]
    return xhat, z, logqz, mu, std


# ------------------------------ reference ------------------------------

def _vae_reference(x, eps, params):
    """Pure-JAX f32 reference using the original (unsimplified) formulas."""
    (ew0, eb0, ew1, eb1, ew2, eb2, ew3, eb3,
     dw0, db0, dw1, db1, dw2, db2, dw3, db3) = params
    x = x.reshape(-1, XDIM)
    h = jax.nn.relu(x @ ew0 + eb0)
    h = jax.nn.relu(h @ ew1 + eb1)
    h = jax.nn.relu(h @ ew2 + eb2)
    scores = h @ ew3 + eb3
    mu, sigma = scores[:, :ZDIM], scores[:, ZDIM:]
    std = jnp.exp(sigma)
    z = mu + std * eps
    logqz = -jnp.log(std) - _HALF_LOG_2PI - 0.5 * ((z - mu) / std) ** 2
    d = jax.nn.relu(z @ dw0 + db0)
    d = jax.nn.relu(d @ dw1 + db1)
    d = jax.nn.relu(d @ dw2 + db2)
    xhat = jax.nn.sigmoid(d @ dw3 + db3)
    return xhat, z, logqz, mu, std


if __name__ == "__main__":
    key = jax.random.PRNGKey(0)
    k_params, k_x, k_eps = jax.random.split(key, 3)

    batch = 8
    params = init_vae_params(k_params, ZDIM)
    packed = pack_vae_params(params)
    x = jax.random.uniform(k_x, (batch, XDIM), jnp.float32)      # tabular input in [0,1)
    eps = jax.random.normal(k_eps, (batch, ZDIM), jnp.float32)   # rsample noise

    outs = jax.block_until_ready(vae_forward(x, eps, packed))

    ref = _vae_reference(x, eps, params)
    # bf16 matmuls (f32 accumulation) vs f32 reference: tolerance loosened.
    for o, r in zip(outs, ref):
        assert o.shape == r.shape and o.dtype == r.dtype
        assert float(jnp.max(jnp.abs(o - r))) < 2e-2, "mismatch vs reference"

    print("KERNEL_OK")
</pallas_src>

<mosaic_0001>
module attributes {stable_mosaic.version = 11 : i64} {
  func.func @_vae_kernel(%arg0: i32, %arg1: memref<8x128xf32, #tpu.memory_space<vmem>>, %arg2: memref<1296x256xbf16, #tpu.memory_space<vmem>>, %arg3: memref<8x128xf32, #tpu.memory_space<vmem>>) attributes {dimension_semantics = [#tpu.dimension_semantics<parallel>], iteration_bounds = array<i64: 1>, scalar_prefetch = 0 : i64, scratch_operands = 0 : i64, tpu.core_type = #tpu.core_type<tc>, window_params = [{transform_indices = @transform_0, window_bounds = array<i64: 8, 128>}, {pipeline_mode = #tpu.pipeline_mode<synchronous>, transform_indices = @transform_1, window_bounds = array<i64: 1296, 256>}, {transform_indices = @transform_2, window_bounds = array<i64: 8, 128>}]} {
    %c0 = arith.constant 0 : index
    %c0_0 = arith.constant 0 : index
    %0 = vector.load %arg1[%c0, %c0_0] : memref<8x128xf32, #tpu.memory_space<vmem>>, vector<8x128xf32>
    %1 = vector.extract_strided_slice %0 {offsets = [0, 120], sizes = [8, 8], strides = [1, 1]} : vector<8x128xf32> to vector<8x8xf32>
    %2 = arith.truncf %0 : vector<8x128xf32> to vector<8x128xbf16>
    %c0_1 = arith.constant 0 : index
    %c0_2 = arith.constant 0 : index
    %3 = vector.load %arg2[%c0_1, %c0_2] : memref<1296x256xbf16, #tpu.memory_space<vmem>>, vector<128x128xbf16>
    %cst = arith.constant dense<0.000000e+00> : vector<8x128xf32>
    %4 = tpu.matmul %2, %3, %cst {dimension_numbers = #tpu.dot_dimension_numbers<[1], [0], [0], [1], [0, 0, 1, 1], [], []>} : vector<8x128xbf16>, vector<128x128xbf16>, vector<8x128xf32> -> vector<8x128xf32>
    %c1168 = arith.constant 1168 : index
    %c0_3 = arith.constant 0 : index
    %5 = vector.load %arg2[%c1168, %c0_3] : memref<1296x256xbf16, #tpu.memory_space<vmem>>, vector<1x128xbf16>
    %6 = arith.extf %5 : vector<1x128xbf16> to vector<1x128xf32>
    %7 = vector.broadcast %6 : vector<1x128xf32> to vector<8x128xf32>
    %8 = arith.addf %4, %7 : vector<8x128xf32>
    %cst_4 = arith.constant 0.000000e+00 : f32
    %9 = vector.broadcast %cst_4 : f32 to vector<8x128xf32>
    %10 = arith.maximumf %8, %9 : vector<8x128xf32>
    %11 = arith.truncf %10 : vector<8x128xf32> to vector<8x128xbf16>
    %c128 = arith.constant 128 : index
    %c0_5 = arith.constant 0 : index
    %12 = vector.load %arg2[%c128, %c0_5] : memref<1296x256xbf16, #tpu.memory_space<vmem>>, vector<128x256xbf16>
    %cst_6 = arith.constant dense<0.000000e+00> : vector<8x256xf32>
    %13 = tpu.matmul %11, %12, %cst_6 {dimension_numbers = #tpu.dot_dimension_numbers<[1], [0], [0], [1], [0, 0, 1, 1], [], []>} : vector<8x128xbf16>, vector<128x256xbf16>, vector<8x256xf32> -> vector<8x256xf32>
    %c1184 = arith.constant 1184 : index
    %c0_7 = arith.constant 0 : index
    %14 = vector.load %arg2[%c1184, %c0_7] : memref<1296x256xbf16, #tpu.memory_space<vmem>>, vector<1x256xbf16>
    %15 = arith.extf %14 : vector<1x256xbf16> to vector<1x256xf32>
    %16 = vector.broadcast %15 : vector<1x256xf32> to vector<8x256xf32>
    %17 = arith.addf %13, %16 : vector<8x256xf32>
    %cst_8 = arith.constant 0.000000e+00 : f32
    %18 = vector.broadcast %cst_8 : f32 to vector<8x256xf32>
    %19 = arith.maximumf %17, %18 : vector<8x256xf32>
    %20 = arith.truncf %19 : vector<8x256xf32> to vector<8x256xbf16>
    %c256 = arith.constant 256 : index
    %c0_9 = arith.constant 0 : index
    %21 = vector.load %arg2[%c256, %c0_9] : memref<1296x256xbf16, #tpu.memory_space<vmem>>, vector<256x128xbf16>
    %cst_10 = arith.constant dense<0.000000e+00> : vector<8x128xf32>
    %22 = tpu.matmul %20, %21, %cst_10 {dimension_numbers = #tpu.dot_dimension_numbers<[1], [0], [0], [1], [0, 0, 1, 1], [], []>} : vector<8x256xbf16>, vector<256x128xbf16>, vector<8x128xf32> -> vector<8x128xf32>
    %c1200 = arith.constant 1200 : index
    %c0_11 = arith.constant 0 : index
    %23 = vector.load %arg2[%c1200, %c0_11] : memref<1296x256xbf16, #tpu.memory_space<vmem>>, vector<1x128xbf16>
    %24 = arith.extf %23 : vector<1x128xbf16> to vector<1x128xf32>
    %25 = vector.broadcast %24 : vector<1x128xf32> to vector<8x128xf32>
    %26 = arith.addf %22, %25 : vector<8x128xf32>
    %cst_12 = arith.constant 0.000000e+00 : f32
    %27 = vector.broadcast %cst_12 : f32 to vector<8x128xf32>
    %28 = arith.maximumf %26, %27 : vector<8x128xf32>
    %29 = arith.truncf %28 : vector<8x128xf32> to vector<8x128xbf16>
    %c512 = arith.constant 512 : index
    %c0_13 = arith.constant 0 : index
    %30 = vector.load %arg2[%c512, %c0_13] : memref<1296x256xbf16, #tpu.memory_space<vmem>>, vector<128x128xbf16>
    %cst_14 = arith.constant dense<0.000000e+00> : vector<8x128xf32>
    %31 = tpu.matmul %29, %30, %cst_14 {dimension_numbers = #tpu.dot_dimension_numbers<[1], [0], [0], [1], [0, 0, 1, 1], [], []>} : vector<8x128xbf16>, vector<128x128xbf16>, vector<8x128xf32> -> vector<8x128xf32>
    %c1216 = arith.constant 1216 : index
    %c0_15 = arith.constant 0 : index
    %32 = vector.load %arg2[%c1216, %c0_15] : memref<1296x256xbf16, #tpu.memory_space<vmem>>, vector<1x128xbf16>
    %33 = arith.extf %32 : vector<1x128xbf16> to vector<1x128xf32>
    %34 = vector.broadcast %33 : vector<1x128xf32> to vector<8x128xf32>
    %35 = arith.addf %31, %34 : vector<8x128xf32>
    %36 = vector.extract_strided_slice %35 {offsets = [0, 0], sizes = [8, 8], strides = [1, 1]} : vector<8x128xf32> to vector<8x8xf32>
    %37 = vector.extract_strided_slice %35 {offsets = [0, 8], sizes = [8, 8], strides = [1, 1]} : vector<8x128xf32> to vector<8x8xf32>
    %38 = math.exp %37 : vector<8x8xf32>
    %39 = arith.mulf %38, %1 : vector<8x8xf32>
    %40 = arith.addf %36, %39 : vector<8x8xf32>
    %cst_16 = arith.constant 0.000000e+00 : f32
    %41 = vector.broadcast %cst_16 : f32 to vector<8x8xf32>
    %42 = arith.subf %41, %37 : vector<8x8xf32>
    %cst_17 = arith.constant 0.918938517 : f32
    %43 = vector.broadcast %cst_17 : f32 to vector<8x8xf32>
    %44 = arith.subf %42, %43 : vector<8x8xf32>
    %45 = arith.mulf %1, %1 : vector<8x8xf32>
    %cst_18 = arith.constant 5.000000e-01 : f32
    %46 = vector.broadcast %cst_18 : f32 to vector<8x8xf32>
    %47 = arith.mulf %46, %45 : vector<8x8xf32>
    %48 = arith.subf %44, %47 : vector<8x8xf32>
    %49 = arith.truncf %40 : vector<8x8xf32> to vector<8x8xbf16>
    %c640 = arith.constant 640 : index
    %c0_19 = arith.constant 0 : index
    %50 = vector.load %arg2[%c640, %c0_19] : memref<1296x256xbf16, #tpu.memory_space<vmem>>, vector<8x128xbf16>
    %cst_20 = arith.constant dense<0.000000e+00> : vector<8x128xf32>
    %51 = tpu.matmul %49, %50, %cst_20 {dimension_numbers = #tpu.dot_dimension_numbers<[1], [0], [0], [1], [0, 0, 1, 1], [], []>} : vector<8x8xbf16>, vector<8x128xbf16>, vector<8x128xf32> -> vector<8x128xf32>
    %c1232 = arith.constant 1232 : index
    %c0_21 = arith.constant 0 : index
    %52 = vector.load %arg2[%c1232, %c0_21] : memref<1296x256xbf16, #tpu.memory_space<vmem>>, vector<1x128xbf16>
    %53 = arith.extf %52 : vector<1x128xbf16> to vector<1x128xf32>
    %54 = vector.broadcast %53 : vector<1x128xf32> to vector<8x128xf32>
    %55 = arith.addf %51, %54 : vector<8x128xf32>
    %cst_22 = arith.constant 0.000000e+00 : f32
    %56 = vector.broadcast %cst_22 : f32 to vector<8x128xf32>
    %57 = arith.maximumf %55, %56 : vector<8x128xf32>
    %58 = arith.truncf %57 : vector<8x128xf32> to vector<8x128xbf16>
    %c656 = arith.constant 656 : index
    %c0_23 = arith.constant 0 : index
    %59 = vector.load %arg2[%c656, %c0_23] : memref<1296x256xbf16, #tpu.memory_space<vmem>>, vector<128x256xbf16>
    %cst_24 = arith.constant dense<0.000000e+00> : vector<8x256xf32>
    %60 = tpu.matmul %58, %59, %cst_24 {dimension_numbers = #tpu.dot_dimension_numbers<[1], [0], [0], [1], [0, 0, 1, 1], [], []>} : vector<8x128xbf16>, vector<128x256xbf16>, vector<8x256xf32> -> vector<8x256xf32>
    %c1248 = arith.constant 1248 : index
    %c0_25 = arith.constant 0 : index
    %61 = vector.load %arg2[%c1248, %c0_25] : memref<1296x256xbf16, #tpu.memory_space<vmem>>, vector<1x256xbf16>
    %62 = arith.extf %61 : vector<1x256xbf16> to vector<1x256xf32>
    %63 = vector.broadcast %62 : vector<1x256xf32> to vector<8x256xf32>
    %64 = arith.addf %60, %63 : vector<8x256xf32>
    %cst_26 = arith.constant 0.000000e+00 : f32
    %65 = vector.broadcast %cst_26 : f32 to vector<8x256xf32>
    %66 = arith.maximumf %64, %65 : vector<8x256xf32>
    %67 = arith.truncf %66 : vector<8x256xf32> to vector<8x256xbf16>
    %c784 = arith.constant 784 : index
    %c0_27 = arith.constant 0 : index
    %68 = vector.load %arg2[%c784, %c0_27] : memref<1296x256xbf16, #tpu.memory_space<vmem>>, vector<256x128xbf16>
    %cst_28 = arith.constant dense<0.000000e+00> : vector<8x128xf32>
    %69 = tpu.matmul %67, %68, %cst_28 {dimension_numbers = #tpu.dot_dimension_numbers<[1], [0], [0], [1], [0, 0, 1, 1], [], []>} : vector<8x256xbf16>, vector<256x128xbf16>, vector<8x128xf32> -> vector<8x128xf32>
    %c1264 = arith.constant 1264 : index
    %c0_29 = arith.constant 0 : index
    %70 = vector.load %arg2[%c1264, %c0_29] : memref<1296x256xbf16, #tpu.memory_space<vmem>>, vector<1x128xbf16>
    %71 = arith.extf %70 : vector<1x128xbf16> to vector<1x128xf32>
    %72 = vector.broadcast %71 : vector<1x128xf32> to vector<8x128xf32>
    %73 = arith.addf %69, %72 : vector<8x128xf32>
    %cst_30 = arith.constant 0.000000e+00 : f32
    %74 = vector.broadcast %cst_30 : f32 to vector<8x128xf32>
    %75 = arith.maximumf %73, %74 : vector<8x128xf32>
    %76 = arith.truncf %75 : vector<8x128xf32> to vector<8x128xbf16>
    %c1040 = arith.constant 1040 : index
    %c0_31 = arith.constant 0 : index
    %77 = vector.load %arg2[%c1040, %c0_31] : memref<1296x256xbf16, #tpu.memory_space<vmem>>, vector<128x128xbf16>
    %cst_32 = arith.constant dense<0.000000e+00> : vector<8x128xf32>
    %78 = tpu.matmul %76, %77, %cst_32 {dimension_numbers = #tpu.dot_dimension_numbers<[1], [0], [0], [1], [0, 0, 1, 1], [], []>} : vector<8x128xbf16>, vector<128x128xbf16>, vector<8x128xf32> -> vector<8x128xf32>
    %c1280 = arith.constant 1280 : index
    %c0_33 = arith.constant 0 : index
    %79 = vector.load %arg2[%c1280, %c0_33] : memref<1296x256xbf16, #tpu.memory_space<vmem>>, vector<1x128xbf16>
    %80 = arith.extf %79 : vector<1x128xbf16> to vector<1x128xf32>
    %81 = vector.broadcast %80 : vector<1x128xf32> to vector<8x128xf32>
    %82 = arith.addf %78, %81 : vector<8x128xf32>
    %83 = arith.negf %82 : vector<8x128xf32>
    %84 = math.exp %83 : vector<8x128xf32>
    %cst_34 = arith.constant 1.000000e+00 : f32
    %85 = vector.broadcast %cst_34 : f32 to vector<8x128xf32>
    %86 = arith.addf %85, %84 : vector<8x128xf32>
    %87 = arith.divf %85, %86 : vector<8x128xf32>
    %c0_35 = arith.constant 0 : index
    %c0_36 = arith.constant 0 : index
    %88 = vector.load %arg3[%c0_35, %c0_36] : memref<8x128xf32, #tpu.memory_space<vmem>>, vector<8x128xf32>
    tpu.vector_store %arg3[%c0_35, %c0_36], %87 {strides = array<i32>} : memref<8x128xf32, #tpu.memory_space<vmem>>, vector<8x128xf32>,
    %89 = tpu.concatenate %40, %48, %36, %38 in 1 : vector<8x8xf32>, vector<8x8xf32>, vector<8x8xf32>, vector<8x8xf32> -> vector<8x32xf32>
    %c0_37 = arith.constant 0 : index
    %c96 = arith.constant 96 : index
    %90 = vector.load %arg3[%c0_37, %c96] : memref<8x128xf32, #tpu.memory_space<vmem>>, vector<8x32xf32>
    tpu.vector_store %arg3[%c0_37, %c96], %89 {strides = array<i32>} : memref<8x128xf32, #tpu.memory_space<vmem>>, vector<8x32xf32>,
    return
  }
  func.func @transform_0(%arg0: i32) -> (i32, i32) {
    %c0_i32 = arith.constant 0 : i32
    %c0_i32_0 = arith.constant 0 : i32
    return %arg0, %c0_i32 : i32, i32
  }
  func.func @transform_1(%arg0: i32) -> (i32, i32) {
    %c0_i32 = arith.constant 0 : i32
    %c0_i32_0 = arith.constant 0 : i32
    %c0_i32_1 = arith.constant 0 : i32
    return %c0_i32, %c0_i32_0 : i32, i32
  }
  func.func @transform_2(%arg0: i32) -> (i32, i32) {
    %c0_i32 = arith.constant 0 : i32
    %c0_i32_0 = arith.constant 0 : i32
    return %arg0, %c0_i32 : i32, i32
  }
}

</mosaic_0001>

<bundles_post_ra>
// kernel: vae_forward.1
= control target key start
LH: loop header
LB: loop body
LE: loop exit
PB: predicated region body
PF: predicated region fallthrough
CT: control target
= control target key end

     0   :  { %7 = vsyncpa [#allocation3], 0  ;;  %s1499_s9 = smov [#allocation2]   ;;  %s1604_s0 = inlined_call_operand.vmem [shape: f32[8,128], index: 0, kind: input, shape index: {}]   ;;  %s1605_s1 = inlined_call_operand.hbm [shape: bf16[1296,256], index: 1, kind: input, shape index: {}]   ;;  %s1606_s2 = inlined_call_operand.vmem [shape: f32[8,128], index: 2, kind: output, shape index: {}]  }
   0x1   :  { %s15_s10 = sshll.u32 %s1499_s9, 4  ;;  %s1475_s13 = scalar_lea.hbm %s1605_s1, 20736  ;;  %s16_s10 = int_to_ptr.vmem [resolvable:$true] %s15_s10 }
   0x2   :  { %p1476_p0 = scmp.ne.s32.totalorder %s1605_s1, %s1475_s13  ;;  %p1479_p1 = scmp.lt.u32.totalorder %s1475_s13, %s1605_s1 }
   0x4   :  { %p1481_p2 = pnand %p1479_p1, %p1476_p0 }
   0x6   :  { %1484 = shalt.err (!%p1481_p2)
}
   0x7   :  { %s1485_s18 = scalar_lea.vmem %s16_s10, 20736  ;;  %p1490_p4 = scmp.lt.s32.totalorder %s16_s10, %s16_s10 }
   0x8   :  { %p1486_p3 = scmp.ne.s32.totalorder %s16_s10, %s1485_s18  ;;  %p1491_p5 = scmp.lt.s32.totalorder %s1485_s18, %s1485_s18 }
   0xa   :  { %p1492_p6 = por %p1491_p5, %p1490_p4 }
   0xc   :  { %p1493_p7 = pnand %p1492_p6, %p1486_p3 }
   0xe   :  { %1496 = shalt.err (!%p1493_p7)
}
   0xf   :  { %s1500_s19 = smov 128   ;;  %s1501_s20 = smov 8  }
  0x10   :  { %21 = dma.hbm_to_vmem [thread:$0]  %s1605_s1, 20736, %s16_s10, [#allocation3], %s1500_s19, %s1500_s19, %s1501_s20  }
  0x11   :  { %1497 = dma.done.wait [#allocation3], 20736  }
  0x12   :  { %1498 = vsyncadd [#allocation3], 4294946560  ;;  %v1502_v0 = vmov 0.0   ;;  %vm1503_vm0 = vmmov 0   ;;  %v1365_v1 = vld [vmem:[#allocation2] ss:$8 sps:$4 sm:$0xff]   ;;  %v46_v40 = vlaneseq }
  0x13   :  { %1290 = vmatprep.subr.bf16.mxu0 %v1502_v0  ;;  %1306 = vmatprep.mubr.msk.bf16.mxu0 %vm1503_vm0, %v1502_v0  ;;  %v1366_v2 = vld [vmem:[#allocation2 + $0x10] ss:$8 sps:$4 sm:$0xff]   ;;  %v1367_v3 = vld [vmem:[#allocation2 + $0x20] ss:$8 sps:$4 sm:$0xff]   ;;  %v1373_v4 = vld [vmem:[#allocation2 + $0x84] ss:$8 sps:$4 sm:$0xff]  }
  0x14   :  { %1291 = vmatpush3.bf16.msra.mxu0 %v1365_v1  ;;  %v1375_v5 = vld [vmem:[#allocation2 + $0x80] ss:$8 sps:$4 sm:$0xff]   ;;  %v1368_v6 = vld [vmem:[#allocation2 + $0x30] ss:$8 sps:$4 sm:$0xff]   ;;  %v1376_v7 = vld [vmem:[#allocation2 + $0x94] ss:$8 sps:$4 sm:$0xff]   ;;  %247 = vmatprep.subr.bf16.mxu1 %v1373_v4 }
  0x15   :  { %1292 = vmatprep.subr.bf16.mxu0 %v1502_v0  ;;  %248 = vmatpush1.bf16.msra.mxu1 %v1375_v5  ;;  %v1378_v8 = vld [vmem:[#allocation2 + $0x90] ss:$8 sps:$4 sm:$0xff]   ;;  %v1379_v9 = vld [vmem:[#allocation2 + $0xa4] ss:$8 sps:$4 sm:$0xff]   ;;  %v1369_v10 = vld [vmem:[#allocation2 + $0x40] ss:$8 sps:$4 sm:$0xff]  }
  0x16   :  { %249 = vmatprep.subr.bf16.mxu1 %v1376_v7  ;;  %v1381_v11 = vld [vmem:[#allocation2 + $0xa0] ss:$8 sps:$4 sm:$0xff]   ;;  %v1370_v12 = vld [vmem:[#allocation2 + $0x50] ss:$8 sps:$4 sm:$0xff]   ;;  %v1382_v13 = vld [vmem:[#allocation2 + $0xb4] ss:$8 sps:$4 sm:$0xff]  }
  0x17   :  { %v1384_v14 = vld [vmem:[#allocation2 + $0xb0] ss:$8 sps:$4 sm:$0xff]   ;;  %v1385_v15 = vld [vmem:[#allocation2 + $0xc4] ss:$8 sps:$4 sm:$0xff]   ;;  %v1371_v16 = vld [vmem:[#allocation2 + $0x60] ss:$8 sps:$4 sm:$0xff]  }
  0x18   :  { %1293 = vmatpush3.bf16.msra.mxu0 %v1366_v2  ;;  %v1387_v17 = vld [vmem:[#allocation2 + $0xc0] ss:$8 sps:$4 sm:$0xff]   ;;  %v1388_v18 = vld [vmem:[#allocation2 + $0xd4] ss:$8 sps:$4 sm:$0xff]   ;;  %v1372_v19 = vld [vmem:[#allocation2 + $0x70] ss:$8 sps:$4 sm:$0xff]  }
  0x19   :  { %1294 = vmatprep.subr.bf16.mxu0 %v1502_v0  ;;  %250 = vmatpush1.bf16.msra.mxu1 %v1378_v8  ;;  %v1547_v20 = vld [vmem:[%s1604_s0] sm:$0xff]  ;;  %v1390_v21 = vld [vmem:[#allocation2 + $0xd0] ss:$8 sps:$4 sm:$0xff]   ;;  %v1394_v25 = vld [vmem:[#allocation2 + $0xf4] ss:$8 sps:$4 sm:$0xff]   ;;  %v1504_v27 = vmov 0  }
  0x1a   :  { %251 = vmatprep.subr.bf16.mxu1 %v1379_v9  ;;  %v1391_v22 = vld [vmem:[#allocation2 + $0xe4] ss:$8 sps:$4 sm:$0xff]   ;;  %v27_v23 = vpack.c.bf16 %v1547_v20, %v1547_v20  ;;  %v1393_v24 = vld [vmem:[#allocation2 + $0xe0] ss:$8 sps:$4 sm:$0xff]   ;;  %v1396_v26 = vld [vmem:[#allocation2 + $0xf0] ss:$8 sps:$4 sm:$0xff]   ;;  %279 = vmatprep.mubr.bf16.mxu1 %v1504_v27 }
  0x1b   :  { %v1397_v28 = vld [vmem:[#allocation2 + $0x180] ss:$8 sps:$4 sm:$0xff]   ;;  %v1399_v30 = vld [vmem:[#allocation2 + $0x190] ss:$8 sps:$4 sm:$0xff]   ;;  %v47_v41 = vshrl.u32 %v46_v40, 7  ;;  %s1505_s0 = smov 16  }
  0x1c   :  { %1295 = vmatpush3.bf16.msra.mxu0 %v1367_v3  ;;  %v1398_v29 = vld [vmem:[#allocation2 + $0x100] ss:$8 sps:$4 sm:$0xff]   ;;  %v1400_v31 = vld [vmem:[#allocation2 + $0x110] ss:$8 sps:$4 sm:$0xff]   ;;  %581 = vrot.lane.b32.xlu0 %v1547_v20, %s1505_s0  ;;  %vm611_vm1 = vcmask 1043456   ;;  %s1506_s24 = smov 120  }
  0x1d   :  { %1296 = vmatprep.subr.bf16.mxu0 %v1502_v0  ;;  %252 = vmatpush1.bf16.msra.mxu1 %v1381_v11  ;;  %v1401_v32 = vld [vmem:[#allocation2 + $0x1a0] ss:$8 sps:$4 sm:$0xff]   ;;  %v1403_v34 = vld [vmem:[#allocation2 + $0x1b0] ss:$8 sps:$4 sm:$0xff]   ;;  %v1554_v44 = vsub.s32 0, %v47_v41  ;;  %vm607_vm2 = vcmask 64512  }
  0x1e   :  { %253 = vmatprep.subr.bf16.mxu1 %v1382_v13  ;;  %v1402_v33 = vld [vmem:[#allocation2 + $0x120] ss:$8 sps:$4 sm:$0xff]   ;;  %v1404_v35 = vld [vmem:[#allocation2 + $0x130] ss:$8 sps:$4 sm:$0xff]   ;;  %vm1111_vm3 = vcmask 130048   ;;  %vm1113_vm4 = vcmask 195584  }
  0x1f   :  { %v1405_v36 = vld [vmem:[#allocation2 + $0x1c0] ss:$8 sps:$4 sm:$0xff]   ;;  %v1407_v38 = vld [vmem:[#allocation2 + $0x1d0] ss:$8 sps:$4 sm:$0xff]   ;;  %s1507_s25 = smov 96   ;;  %vm1119_vm5 = vcmask 1048320  }
  0x20   :  { %1297 = vmatpush3.bf16.msra.mxu0 %v1368_v6  ;;  %v1406_v37 = vld [vmem:[#allocation2 + $0x140] ss:$8 sps:$4 sm:$0xff]   ;;  %v1408_v39 = vld [vmem:[#allocation2 + $0x150] ss:$8 sps:$4 sm:$0xff]  }
  0x21   :  { %1298 = vmatprep.subr.bf16.mxu0 %v1502_v0  ;;  %254 = vmatpush1.bf16.msra.mxu1 %v1384_v14  ;;  %v44_v42 = vld [vmem:[#allocation2 + $0x490] sm:$0x1]  ;;  %v1409_v53 = vld [vmem:[#allocation2 + $0x1e0] ss:$8 sps:$4 sm:$0xff]  }
  0x22   :  { %255 = vmatprep.subr.bf16.mxu1 %v1385_v15  ;;  %v45_v43 = vunpack.c.l.bf16 %v44_v42  ;;  %v1410_v54 = vld [vmem:[#allocation2 + $0x160] ss:$8 sps:$4 sm:$0xff]   ;;  %v1411_v55 = vld [vmem:[#allocation2 + $0x1f0] ss:$8 sps:$4 sm:$0xff]  }
  0x23   :  { %v1412_v56 = vld [vmem:[#allocation2 + $0x170] ss:$8 sps:$4 sm:$0xff]   ;;  %v1413_v57 = vld [vmem:[#allocation2 + $0x200] ss:$8 sps:$4 sm:$0xff]  }
  0x24   :  { %1299 = vmatpush3.bf16.msra.mxu0 %v1369_v10  ;;  %v49_v45 = vrot.slane %v45_v43, %v1554_v44  ;;  %v1414_v58 = vld [vmem:[#allocation2 + $0x210] ss:$8 sps:$4 sm:$0xff]   ;;  %v1415_v59 = vld [vmem:[#allocation2 + $0x220] ss:$8 sps:$4 sm:$0xff]  }
  0x25   :  { %1300 = vmatprep.subr.bf16.mxu0 %v1502_v0  ;;  %256 = vmatpush1.bf16.msra.mxu1 %v1387_v17  ;;  %v1416_v60 = vld [vmem:[#allocation2 + $0x230] ss:$8 sps:$4 sm:$0xff]   ;;  %v1417_v61 = vld [vmem:[#allocation2 + $0x240] ss:$8 sps:$4 sm:$0xff]   ;;  %v592_v17 = vmul.f32 %v1547_v20, %v1547_v20 }
  0x26   :  { %257 = vmatprep.subr.bf16.mxu1 %v1388_v18  ;;  %v1418_v62 = vld [vmem:[#allocation2 + $0x250] ss:$8 sps:$4 sm:$0xff]   ;;  %v156_v63 = vld [vmem:[#allocation2 + $0x4a0] sm:$0x11] }
  0x27   :  { %v157_v1 = vunpack.c.l.bf16 %v156_v63  ;;  %v158_v2 = vunpack.c.h.bf16 %v156_v63  ;;  %v1419_v15 = vld [vmem:[#allocation2 + $0x260] ss:$8 sps:$4 sm:$0xff]   ;;  %v593_v18 = vmul.f32 0.5, %v592_v17 }
  0x28   :  { %1301 = vmatpush3.bf16.msra.mxu0 %v1370_v12  ;;  %v484_v20 = vld [vmem:[#allocation2 + $0x4c0] sm:$0x1] }
  0x29   :  { %1302 = vmatprep.subr.bf16.mxu0 %v1502_v0  ;;  %258 = vmatpush1.bf16.msra.mxu1 %v1390_v21  ;;  %v162_v3 = vrot.slane %v157_v1, %v1554_v44  ;;  %v166_v4 = vrot.slane %v158_v2, %v1554_v44  ;;  %v1435_v1 = vld [vmem:[#allocation2 + $0x2d4] ss:$8 sps:$4 sm:$0xff]   ;;  %v1452_v17 = vld [vmem:[#allocation2 + $0x340] ss:$8 sps:$4 sm:$0xff]  }
  0x2a   :  { %259 = vmatprep.subr.bf16.mxu1 %v1391_v22  ;;  %595 = vrot.lane.b32.xlu1 %v593_v18, %s1505_s0  ;;  %v1453_v18 = vld [vmem:[#allocation2 + $0x3d0] ss:$8 sps:$4 sm:$0xff]  }
  0x2c   :  { %1303 = vmatpush3.bf16.msra.mxu0 %v1371_v16  ;;  %v1420_v16 = vld [vmem:[#allocation2 + $0x270] ss:$8 sps:$4 sm:$0xff]  }
  0x2d   :  { %1304 = vmatprep.subr.bf16.mxu0 %v1502_v0  ;;  %260 = vmatpush1.bf16.msra.mxu1 %v1393_v24 }
  0x2e   :  { %261 = vmatprep.subr.bf16.mxu1 %v1394_v25 }
  0x30   :  { %1305 = vmatpush3.bf16.msra.mxu0 %v1372_v19  ;;  %v324_v19 = vld [vmem:[#allocation2 + $0x4b0] sm:$0x1] }
  0x31   :  { %262 = vmatpush1.bf16.msra.mxu1 %v1396_v26  ;;  %1226 = vmatprep.subr.bf16.mxu0 %v1397_v28  ;;  %v325_v21 = vunpack.c.l.bf16 %v324_v19  ;;  %v1454_v19 = vld [vmem:[#allocation2 + $0x350] ss:$8 sps:$4 sm:$0xff]  }
  0x32   :  { %1310 = vmatprep.subr.bf16.mxu1 %v1502_v0 }
  0x33   :  { %1307 = vmatmul.mubr.bf16.vlgmr.msra.gmra.mrb[0].mxu0 %v27_v23  ;;  %v329_v23 = vrot.slane %v325_v21, %v1554_v44  ;;  %v1455_v21 = vld [vmem:[#allocation2 + $0x3e0] ss:$8 sps:$4 sm:$0xff]  }
  0x34   :  { %1227 = vmatpush3.bf16.msra.mxu0 %v1398_v29 }
  0x35   :  { %1228 = vmatprep.subr.bf16.mxu0 %v1399_v30 }
  0x38   :  { %1229 = vmatpush3.bf16.msra.mxu0 %v1400_v31 }
  0x39   :  { %1230 = vmatprep.subr.bf16.mxu0 %v1401_v32  ;;  %v600_v32 = vld [vmem:[#allocation2 + $0x280] sm:$0xf] }
  0x3c   :  { %1231 = vmatpush3.bf16.msra.mxu0 %v1402_v33  ;;  %v613_v33 = vsel %vm611_vm1, %v600_v32, 0 }
  0x3d   :  { %1232 = vmatprep.subr.bf16.mxu0 %v1403_v34  ;;  %v485_v34 = vunpack.c.l.bf16 %v484_v20 }
  0x40   :  { %1233 = vmatpush3.bf16.msra.mxu0 %v1404_v35  ;;  %v489_v35 = vrot.slane %v485_v34, %v1554_v44  ;;  %v1458_v34 = vld [vmem:[#allocation2 + $0x370] ss:$8 sps:$4 sm:$0xff]  }
  0x41   :  { %1234 = vmatprep.subr.bf16.mxu0 %v1405_v36 }
  0x44   :  { %1235 = vmatpush3.bf16.msra.mxu0 %v1406_v37 }
  0x45   :  { %1236 = vmatprep.subr.bf16.mxu0 %v1407_v38 }
  0x48   :  { %1237 = vmatpush3.bf16.msra.mxu0 %v1408_v39 }
  0x49   :  { %1238 = vmatprep.subr.bf16.mxu0 %v1409_v53  ;;  %v1427_v53 = vld [vmem:[#allocation2 + $0x2b0] ss:$8 sps:$4 sm:$0xff]  }
  0x4c   :  { %1239 = vmatpush3.bf16.msra.mxu0 %v1410_v54 }
  0x4d   :  { %1240 = vmatprep.subr.bf16.mxu0 %v1411_v55  ;;  %v1432_v55 = vld [vmem:[#allocation2 + $0x2c4] ss:$8 sps:$4 sm:$0xff]  }
  0x50   :  { %1241 = vmatpush3.bf16.msra.mxu0 %v1412_v56 }
  0x51   :  { %1330 = vmatprep.subr.bf16.mxu0 %v1502_v0 }
  0x8e   :  { %v582_v42 = vpop.permute.xlu0 %581 }
 0x106   :  { %v132_v46 = vpop.f32.mrb[0].mxu0 }
 0x107   :  { %v133_v47 = vadd.f32 %v132_v46, %v49_v45  ;;  %v1308_v48 = vpop.f32.mrb[1].mxu0  ;;  %v1421_v45 = vld [vmem:[#allocation2 + $0x290] ss:$8 sps:$4 sm:$0xff]   ;;  %v1423_v46 = vld [vmem:[#allocation2 + $0x294] ss:$8 sps:$4 sm:$0xff]  }
 0x108   :  { %v135_v49 = vpop.f32.mrb[2].mxu0  ;;  %v1426_v48 = vld [vmem:[#allocation2 + $0x2a4] ss:$8 sps:$4 sm:$0xff]  }
 0x109   :  { %v138_v50 = vmax.f32 %v133_v47, 0.0  ;;  %v1309_v51 = vpop.f32.mrb[3].mxu0  ;;  %v1424_v49 = vld [vmem:[#allocation2 + $0x2a0] ss:$8 sps:$4 sm:$0xff]  }
 0x10b   :  { %v139_v52 = vpack.c.bf16 %v138_v50, %v138_v50  ;;  %v1429_v50 = vld [vmem:[#allocation2 + $0x2b4] ss:$8 sps:$4 sm:$0xff]  }
 0x10d   :  { %280 = vmatmul.mubr.bf16.vlgmr.msra.gmra.mrb[0].mxu1 %v139_v52  ;;  %v596_v52 = vpop.permute.xlu1 %595 }
 0x10e   :  { %1326 = vmatprep.mubr.msk.bf16.mxu1 %vm1503_vm0, %v1502_v0  ;;  %1311 = vmatpush3.bf16.msra.mxu1 %v1413_v57 }
 0x10f   :  { %1312 = vmatprep.subr.bf16.mxu1 %v1502_v0 }
 0x112   :  { %1313 = vmatpush3.bf16.msra.mxu1 %v1414_v58 }
 0x113   :  { %1314 = vmatprep.subr.bf16.mxu1 %v1502_v0 }
 0x116   :  { %1315 = vmatpush3.bf16.msra.mxu1 %v1415_v59 }
 0x117   :  { %1316 = vmatprep.subr.bf16.mxu1 %v1502_v0 }
 0x11a   :  { %1317 = vmatpush3.bf16.msra.mxu1 %v1416_v60 }
 0x11b   :  { %1318 = vmatprep.subr.bf16.mxu1 %v1502_v0 }
 0x11e   :  { %1319 = vmatpush3.bf16.msra.mxu1 %v1417_v61  ;;  %v1430_v61 = vld [vmem:[#allocation2 + $0x2c0] ss:$8 sps:$4 sm:$0xff]  }
 0x11f   :  { %1320 = vmatprep.subr.bf16.mxu1 %v1502_v0 }
 0x122   :  { %1321 = vmatpush3.bf16.msra.mxu1 %v1418_v62 }
 0x123   :  { %1322 = vmatprep.subr.bf16.mxu1 %v1502_v0 }
 0x126   :  { %1323 = vmatpush3.bf16.msra.mxu1 %v1419_v15  ;;  %v1450_v15 = vld [vmem:[#allocation2 + $0x330] ss:$8 sps:$4 sm:$0xff]  }
 0x127   :  { %1324 = vmatprep.subr.bf16.mxu1 %v1502_v0 }
 0x12a   :  { %1325 = vmatpush3.bf16.msra.mxu1 %v1420_v16  ;;  %v1451_v16 = vld [vmem:[#allocation2 + $0x3c0] ss:$8 sps:$4 sm:$0xff]  }
 0x12b   :  { %764 = vmatprep.subr.bf16.mxu1 %v1423_v46 }
 0x1e0   :  { %v281_v5 = vpop.f32.mrb[0].mxu1 }
 0x1e1   :  { %v282_v6 = vadd.f32 %v281_v5, %v162_v3  ;;  %v283_v7 = vpop.f32.mrb[1].mxu1  ;;  %v1433_v3 = vld [vmem:[#allocation2 + $0x2d0] ss:$8 sps:$4 sm:$0xff]   ;;  %v1436_v5 = vld [vmem:[#allocation2 + $0x2e0] ss:$8 sps:$4 sm:$0xff]  }
 0x1e2   :  { %v284_v8 = vadd.f32 %v283_v7, %v166_v4  ;;  %v285_v9 = vpop.f32.mrb[2].mxu1  ;;  %v1438_v4 = vld [vmem:[#allocation2 + $0x2e4] ss:$8 sps:$4 sm:$0xff]   ;;  %v1439_v7 = vld [vmem:[#allocation2 + $0x2f0] ss:$8 sps:$4 sm:$0xff]  }
 0x1e3   :  { %v288_v10 = vmax.f32 %v282_v6, 0.0  ;;  %v286_v11 = vpop.f32.mrb[3].mxu1  ;;  %v1441_v6 = vld [vmem:[#allocation2 + $0x2f4] ss:$8 sps:$4 sm:$0xff]   ;;  %v1442_v9 = vld [vmem:[#allocation2 + $0x300] ss:$8 sps:$4 sm:$0xff]  }
 0x1e4   :  { %v289_v12 = vmax.f32 %v284_v8, 0.0  ;;  %v1444_v8 = vld [vmem:[#allocation2 + $0x304] ss:$8 sps:$4 sm:$0xff]   ;;  %v1446_v11 = vld [vmem:[#allocation2 + $0x310] ss:$8 sps:$4 sm:$0xff]  }
 0x1e5   :  { %v290_v14 = vpack.c.bf16 %v288_v10, %v288_v10  ;;  %v1445_v10 = vld [vmem:[#allocation2 + $0x390] ss:$8 sps:$4 sm:$0xff]  }
 0x1e6   :  { %v291_v13 = vpack.c.bf16 %v289_v12, %v289_v12  ;;  %v1447_v12 = vld [vmem:[#allocation2 + $0x3a0] ss:$8 sps:$4 sm:$0xff]  }
 0x1e8   :  { %458 = vmatprep.mubr.bf16.mxu0 %v291_v13  ;;  %v1448_v13 = vld [vmem:[#allocation2 + $0x320] ss:$8 sps:$4 sm:$0xff]  }
 0x1e9   :  { %459 = vmatmul.mubr.bf16.vlgmr.msra.gmra.mrb[4].mxu0 %v290_v14  ;;  %v1449_v14 = vld [vmem:[#allocation2 + $0x3b0] ss:$8 sps:$4 sm:$0xff]  }
 0x1ea   :  { %1332 = vmatprep.mubr.msk.bf16.mxu0 %vm1503_vm0, %v1502_v0  ;;  %1331 = vmatpush3.bf16.msra.mxu0 %v613_v33  ;;  %v1457_v33 = vld [vmem:[#allocation2 + $0x3f0] ss:$8 sps:$4 sm:$0xff]  }
 0x1eb   :  { %1259 = vmatprep.subr.bf16.mxu0 %v1445_v10 }
 0x2bc   :  { %v1242_v22 = vpop.f32.mrb[4].mxu0 }
 0x2bd   :  { %v1243_v24 = vpop.f32.mrb[5].mxu0 }
 0x2be   :  { %v1244_v25 = vadd.f32 %v1243_v24, %v1242_v22  ;;  %v1245_v26 = vpop.f32.mrb[6].mxu0  ;;  %v1456_v22 = vld [vmem:[#allocation2 + $0x360] ss:$8 sps:$4 sm:$0xff]  }
 0x2bf   :  { %v1246_v28 = vpop.f32.mrb[7].mxu0 }
 0x2c0   :  { %v461_v29 = vadd.f32 %v1244_v25, %v329_v23  ;;  %v601_v23 = vld [vmem:[#allocation2 + $0x4d0] sm:$0x1] }
 0x2c1   :  { %v602_v24 = vunpack.c.l.bf16 %v601_v23 }
 0x2c2   :  { %v466_v30 = vmax.f32 %v461_v29, 0.0 }
 0x2c3   :  { %v606_v25 = vrot.slane %v602_v24, %v1554_v44 }
 0x2c4   :  { %v467_v31 = vpack.c.bf16 %v466_v30, %v466_v30 }
 0x2c6   :  { %1327 = vmatmul.mubr.bf16.vlgmr.msra.gmra.mrb[4].mxu1 %v467_v31 }
 0x2c7   :  { %796 = vmatprep.mubr.bf16.mxu1 %v1504_v27  ;;  %765 = vmatpush1.bf16.msra.mxu1 %v1421_v45 }
 0x2c8   :  { %766 = vmatprep.subr.bf16.mxu1 %v1426_v48 }
 0x2cb   :  { %767 = vmatpush1.bf16.msra.mxu1 %v1424_v49 }
 0x2cc   :  { %768 = vmatprep.subr.bf16.mxu1 %v1429_v50 }
 0x2cf   :  { %769 = vmatpush1.bf16.msra.mxu1 %v1427_v53 }
 0x2d0   :  { %770 = vmatprep.subr.bf16.mxu1 %v1432_v55 }
 0x2d3   :  { %771 = vmatpush1.bf16.msra.mxu1 %v1430_v61 }
 0x2d4   :  { %772 = vmatprep.subr.bf16.mxu1 %v1435_v1 }
 0x2d7   :  { %773 = vmatpush1.bf16.msra.mxu1 %v1433_v3 }
 0x2d8   :  { %774 = vmatprep.subr.bf16.mxu1 %v1438_v4 }
 0x2db   :  { %775 = vmatpush1.bf16.msra.mxu1 %v1436_v5 }
 0x2dc   :  { %776 = vmatprep.subr.bf16.mxu1 %v1441_v6 }
 0x2df   :  { %777 = vmatpush1.bf16.msra.mxu1 %v1439_v7 }
 0x2e0   :  { %778 = vmatprep.subr.bf16.mxu1 %v1444_v8  ;;  %v1001_v8 = vld [vmem:[#allocation2 + $0x500] sm:$0x1] }
 0x2e3   :  { %779 = vmatpush1.bf16.msra.mxu1 %v1442_v9  ;;  %v1002_v9 = vunpack.c.l.bf16 %v1001_v8 }
 0x2e4   :  { %1336 = vmatprep.subr.bf16.mxu1 %v1502_v0 }
 0x2e5   :  { %v1006_v10 = vrot.slane %v1002_v9, %v1554_v44 }
 0x399   :  { %v572_v36 = vpop.f32.mrb[4].mxu1 }
 0x39a   :  { %v573_v37 = vadd.f32 %v572_v36, %v489_v35  ;;  %v1328_v38 = vpop.f32.mrb[5].mxu1  ;;  %v1459_v35 = vld [vmem:[#allocation2 + $0x400] ss:$8 sps:$4 sm:$0xff]  }
 0x39b   :  { %v575_v39 = vpop.f32.mrb[6].mxu1  ;;  %v1460_v36 = vld [vmem:[#allocation2 + $0x380] ss:$8 sps:$4 sm:$0xff]  }
 0x39c   :  { %v578_v40 = vmul.f32 1.442695, %v573_v37  ;;  %1103 = vrot.lane.b32.xlu1 %v573_v37, %s1505_s0  ;;  %v1329_v41 = vpop.f32.mrb[7].mxu1  ;;  %v590_v47 = vsub.f32 0.0, %v573_v37  ;;  %v1462_v38 = vld [vmem:[#allocation2 + $0x420] ss:$8 sps:$4 sm:$0xff]  }
 0x39d   :  { %v1463_v39 = vld [vmem:[#allocation2 + $0x430] ss:$8 sps:$4 sm:$0xff]  }
 0x39e   :  { %1469 = vpow2.f32 %v578_v40  ;;  %v1174_v51 = vadd.f32 -0.9189385, %v590_v47  ;;  %v1464_v40 = vld [vmem:[#allocation2 + $0x440] ss:$8 sps:$4 sm:$0xff]   ;;  %v1465_v41 = vld [vmem:[#allocation2 + $0x450] ss:$8 sps:$4 sm:$0xff]  }
 0x3a0   :  { %v598_v56 = vsub.f32 %v1174_v51, %v596_v52 }
 0x3a8   :  { %v1470_v43 = vpop.eup %1469 }
 0x3a9   :  { %v584_v27 = vmul.f32 %v1470_v43, %v582_v42  ;;  %v1466_v42 = vld [vmem:[#allocation2 + $0x460] ss:$8 sps:$4 sm:$0xff]  }
 0x3ab   :  { %586 = vrot.lane.b32.xlu0 %v584_v27, %s1506_s24 }
 0x3af   :  { %1107 = vrot.lane.b32.xlu0 %v1470_v43, %s1505_s0  ;;  %v673_v43 = vld [vmem:[#allocation2 + $0x4e0] sm:$0x11] }
 0x3b0   :  { %v674_v27 = vunpack.c.l.bf16 %v673_v43  ;;  %v675_v45 = vunpack.c.h.bf16 %v673_v43 }
 0x3b2   :  { %v679_v46 = vrot.slane %v674_v27, %v1554_v44  ;;  %v683_v47 = vrot.slane %v675_v45, %v1554_v44 }
 0x40e   :  { %v1104_v58 = vpop.permute.xlu1 %1103 }
 0x41d   :  { %v587_v54 = vpop.permute.xlu0 %586 }
 0x41e   :  { %v589_v57 = vadd.f32 %v587_v54, %v573_v37  ;;  %v1461_v37 = vld [vmem:[#allocation2 + $0x410] ss:$8 sps:$4 sm:$0xff]  }
 0x420   :  { %v599_v59 = vpack.c.bf16 %v589_v57, %v589_v57  ;;  %v1110_v60 = vsel %vm607_vm2, %v589_v57, %v598_v56 }
 0x421   :  { %v1108_v62 = vpop.permute.xlu0 %1107  ;;  %v1112_v63 = vsel %vm1111_vm3, %v1110_v60, %v1104_v58  ;;  %v1467_v58 = vld [vmem:[#allocation2 + $0x470] ss:$8 sps:$4 sm:$0xff]  }
 0x422   :  { %1333 = vmatmul.mubr.msk.bf16.vlgmr.msra.gmra.mrb[8].mxu0 %vm607_vm2, %v599_v59  ;;  %v1114_v2 = vsel %vm1113_vm4, %v1112_v63, %v1108_v62  ;;  %v1468_v59 = vld [vmem:[#allocation2 + $0x480] ss:$8 sps:$4 sm:$0xff]   ;;  %v841_v60 = vld [vmem:[#allocation2 + $0x4f0] sm:$0x1] }
 0x423   :  { %1116 = vrot.lane.b32.xlu1 %v1114_v2, %s1507_s25  ;;  %1260 = vmatpush3.bf16.msra.mxu0 %v1446_v11  ;;  %v842_v61 = vunpack.c.l.bf16 %v841_v60 }
 0x424   :  { %1261 = vmatprep.subr.bf16.mxu0 %v1447_v12 }
 0x425   :  { %v846_v63 = vrot.slane %v842_v61, %v1554_v44 }
 0x427   :  { %1262 = vmatpush3.bf16.msra.mxu0 %v1448_v13 }
 0x428   :  { %1263 = vmatprep.subr.bf16.mxu0 %v1449_v14 }
 0x42b   :  { %1264 = vmatpush3.bf16.msra.mxu0 %v1450_v15 }
 0x42c   :  { %1265 = vmatprep.subr.bf16.mxu0 %v1451_v16 }
 0x42f   :  { %1266 = vmatpush3.bf16.msra.mxu0 %v1452_v17 }
 0x430   :  { %1267 = vmatprep.subr.bf16.mxu0 %v1453_v18 }
 0x433   :  { %1268 = vmatpush3.bf16.msra.mxu0 %v1454_v19 }
 0x434   :  { %1269 = vmatprep.subr.bf16.mxu0 %v1455_v21 }
 0x437   :  { %1270 = vmatpush3.bf16.msra.mxu0 %v1456_v22 }
 0x438   :  { %1271 = vmatprep.subr.bf16.mxu0 %v1457_v33 }
 0x43b   :  { %1272 = vmatpush3.bf16.msra.mxu0 %v1458_v34 }
 0x43c   :  { %1273 = vmatprep.subr.bf16.mxu0 %v1459_v35 }
 0x43f   :  { %1274 = vmatpush3.bf16.msra.mxu0 %v1460_v36 }
 0x495   :  { %v1117_v19 = vpop.permute.xlu1 %1116 }
 0x4f5   :  { %v649_v26 = vpop.f32.mrb[8].mxu0 }
 0x4f6   :  { %v650_v28 = vadd.f32 %v649_v26, %v606_v25  ;;  %v1334_v29 = vpop.f32.mrb[9].mxu0 }
 0x4f7   :  { %v652_v30 = vpop.f32.mrb[10].mxu0 }
 0x4f8   :  { %v655_v31 = vmax.f32 %v650_v28, 0.0  ;;  %v1335_v32 = vpop.f32.mrb[11].mxu0 }
 0x4fa   :  { %v656_v20 = vpack.c.bf16 %v655_v31, %v655_v31 }
 0x4fc   :  { %797 = vmatmul.mubr.bf16.vlgmr.msra.gmra.mrb[8].mxu1 %v656_v20 }
 0x4fd   :  { %1352 = vmatprep.mubr.msk.bf16.mxu1 %vm1503_vm0, %v1502_v0  ;;  %1337 = vmatpush3.bf16.msra.mxu1 %v1461_v37 }
 0x4fe   :  { %1338 = vmatprep.subr.bf16.mxu1 %v1502_v0 }
 0x501   :  { %1339 = vmatpush3.bf16.msra.mxu1 %v1462_v38 }
 0x502   :  { %1340 = vmatprep.subr.bf16.mxu1 %v1502_v0 }
 0x505   :  { %1341 = vmatpush3.bf16.msra.mxu1 %v1463_v39 }
 0x506   :  { %1342 = vmatprep.subr.bf16.mxu1 %v1502_v0 }
 0x509   :  { %1343 = vmatpush3.bf16.msra.mxu1 %v1464_v40 }
 0x50a   :  { %1344 = vmatprep.subr.bf16.mxu1 %v1502_v0 }
 0x50d   :  { %1345 = vmatpush3.bf16.msra.mxu1 %v1465_v41 }
 0x50e   :  { %1346 = vmatprep.subr.bf16.mxu1 %v1502_v0 }
 0x511   :  { %1347 = vmatpush3.bf16.msra.mxu1 %v1466_v42 }
 0x512   :  { %1348 = vmatprep.subr.bf16.mxu1 %v1502_v0 }
 0x515   :  { %1349 = vmatpush3.bf16.msra.mxu1 %v1467_v58 }
 0x516   :  { %1350 = vmatprep.subr.bf16.mxu1 %v1502_v0 }
 0x519   :  { %1351 = vmatpush3.bf16.msra.mxu1 %v1468_v59 }
 0x5cf   :  { %v798_v48 = vpop.f32.mrb[8].mxu1 }
 0x5d0   :  { %v799_v49 = vadd.f32 %v798_v48, %v679_v46  ;;  %v800_v50 = vpop.f32.mrb[9].mxu1 }
 0x5d1   :  { %v801_v51 = vadd.f32 %v800_v50, %v683_v47  ;;  %v802_v52 = vpop.f32.mrb[10].mxu1 }
 0x5d2   :  { %v805_v53 = vmax.f32 %v799_v49, 0.0  ;;  %v803_v54 = vpop.f32.mrb[11].mxu1 }
 0x5d3   :  { %v806_v55 = vmax.f32 %v801_v51, 0.0 }
 0x5d4   :  { %v807_v57 = vpack.c.bf16 %v805_v53, %v805_v53 }
 0x5d5   :  { %v808_v56 = vpack.c.bf16 %v806_v55, %v806_v55 }
 0x5d7   :  { %975 = vmatprep.mubr.bf16.mxu0 %v808_v56 }
 0x5d8   :  { %976 = vmatmul.mubr.bf16.vlgmr.msra.gmra.mrb[12].mxu0 %v807_v57 }
 0x6ab   :  { %v1275_v62 = vpop.f32.mrb[12].mxu0 }
 0x6ac   :  { %v1276_v1 = vpop.f32.mrb[13].mxu0 }
 0x6ad   :  { %v1277_v2 = vadd.f32 %v1276_v1, %v1275_v62  ;;  %v1278_v3 = vpop.f32.mrb[14].mxu0 }
 0x6ae   :  { %v1279_v4 = vpop.f32.mrb[15].mxu0 }
 0x6af   :  { %v978_v5 = vadd.f32 %v1277_v2, %v846_v63 }
 0x6b1   :  { %v983_v6 = vmax.f32 %v978_v5, 0.0 }
 0x6b3   :  { %v984_v7 = vpack.c.bf16 %v983_v6, %v983_v6 }
 0x6b5   :  { %1353 = vmatmul.mubr.bf16.vlgmr.msra.gmra.mrb[12].mxu1 %v984_v7 }
 0x788   :  { %v1089_v0 = vpop.f32.mrb[12].mxu1 }
 0x789   :  { %v1090_v11 = vadd.f32 %v1089_v0, %v1006_v10  ;;  %v1354_v12 = vpop.f32.mrb[13].mxu1 }
 0x78a   :  { %v1092_v13 = vpop.f32.mrb[14].mxu1 }
 0x78b   :  { %v1216_v14 = vmul.f32 -1.442695, %v1090_v11  ;;  %v1355_v15 = vpop.f32.mrb[15].mxu1 }
 0x78d   :  { %1471 = vpow2.f32 %v1216_v14 }
 0x797   :  { %v1472_v16 = vpop.eup %1471 }
 0x798   :  { %v1098_v17 = vadd.f32 1.0, %v1472_v16 }
 0x79a   :  { %1473 = vrcp.f32 %v1098_v17 }
 0x7a4   :  { %v1474_v18 = vpop.eup %1473 }
 0x7a5   :  { %1101 = vst [vmem:[%s1606_s2] sm:$0xff] %v1474_v18 }
 0x7a6   :  { %1120 = vst.msk [vmem:[%s1606_s2] sm:$0xff] %vm1119_vm5, %v1117_v19 }
 0x7a7   :  { %1125 = vsyncpa [#allocation3], 1 }

</bundles_post_ra>
